<compile_context>
chip_gen: v5e
topology: v5e:2x2
jax: 0.10.0
libtpu: 0.0.40
codegen_flags: <defaults>
</compile_context>

<pallas_src>
import functools

import jax
import jax.numpy as jnp
from jax.experimental import pallas as pl
from jax.experimental.pallas import tpu as pltpu

_LANE = 128


def _round_up(x, m):
    return ((x + m - 1) // m) * m


def _vmem_capacity_bytes():
    try:
        info = pltpu.get_tpu_info()
        cap = int(getattr(info, "vmem_capacity_bytes", 0))
        if cap > 0:
            return cap
    except Exception:
        pass
    return 64 << 20  # conservative default (v7x per-TensorCore VMEM)


def _pad2(arr, rows, cols):
    pr = rows - arr.shape[0]
    pc = cols - arr.shape[1]
    if pr or pc:
        arr = jnp.pad(arr, ((0, pr), (0, pc)))
    return arr


# ---------------------------------------------------------------------------
# Kernels
# ---------------------------------------------------------------------------
def _fused_small_kernel(a_ref, xb_ref, xf_ref, o_ref):
    """Both hops + mean in one shot; A_hat resident in VMEM (small-N path)."""
    a = a_ref[...]                                                      # (n, n) bf16
    h1 = jnp.dot(a, xb_ref[...], preferred_element_type=jnp.float32)
    h1_b = h1.astype(jnp.bfloat16)                                      # hop-2 MXU operand
    h2 = jnp.dot(a, h1_b, preferred_element_type=jnp.float32)
    o_ref[...] = ((xf_ref[...] + h1_b.astype(jnp.float32) + h2)
                  * (1.0 / 3.0)).astype(o_ref.dtype)


def _hop1_kernel(a_ref, b_ref, h1_ref, acc_ref, *, tk, b_resident):
    """h1 = A_hat @ x over (row tiles, contraction tiles); emits bf16 directly."""
    k = pl.program_id(1)

    @pl.when(k == 0)
    def _():
        acc_ref[...] = jnp.zeros_like(acc_ref)

    if b_resident:
        off = pl.multiple_of(k * tk, tk)
        b_blk = b_ref[pl.ds(off, tk), :]          # slice the VMEM-resident operand
    else:
        b_blk = b_ref[...]                        # fallback: per-k streamed block
    acc_ref[...] += jnp.dot(a_ref[...], b_blk, preferred_element_type=jnp.float32)

    @pl.when(k == pl.num_programs(1) - 1)
    def _():
        h1_ref[...] = acc_ref[...].astype(h1_ref.dtype)


def _hop2_kernel(a_ref, b_ref, xf_ref, h1row_ref, o_ref, *, tk, b_resident):
    """out = (x + h1 + A_hat @ h1) / 3; accumulates directly in the f32 output block."""
    k = pl.program_id(1)

    @pl.when(k == 0)
    def _():
        o_ref[...] = jnp.zeros_like(o_ref)

    if b_resident:
        off = pl.multiple_of(k * tk, tk)
        b_blk = b_ref[pl.ds(off, tk), :]
    else:
        b_blk = b_ref[...]
    o_ref[...] += jnp.dot(a_ref[...], b_blk, preferred_element_type=jnp.float32)

    @pl.when(k == pl.num_programs(1) - 1)
    def _():
        o_ref[...] = (xf_ref[...]
                      + h1row_ref[...].astype(jnp.float32)
                      + o_ref[...]) * (1.0 / 3.0)


# ---------------------------------------------------------------------------
# Wrapper
# ---------------------------------------------------------------------------
def gcn_forward(a_hat, x, *, force_tiled=False, tile=None):
    """Two GraphConv hops (norm='both', edge weights folded into a_hat) + mean of [x,h1,h2]."""
    n, d = x.shape
    assert a_hat.shape == (n, n)
    out_dtype = x.dtype

    dp = _round_up(d, _LANE)                     # lane-dense feature dim
    cap = _vmem_capacity_bytes()

    a_b = a_hat if a_hat.dtype == jnp.bfloat16 else a_hat.astype(jnp.bfloat16)
    x_f = _pad2(x.astype(jnp.float32), n, dp)

    # ---------------- small-N fully fused path (A_hat resident in VMEM) -----------------
    n_s = _round_up(n, _LANE)
    small_need = (2 * n_s * n_s * 2               # A_hat bf16 (assume double-buffered)
                  + 2 * n_s * dp * (2 + 4 + 4)    # x_b, x_f, out
                  + (2 << 20))
    if (not force_tiled) and n_s <= 4096 and small_need <= int(cap * 0.45):
        a_p = _pad2(a_b, n_s, n_s)
        xf_p = _pad2(x_f, n_s, dp)
        xb_p = xf_p.astype(jnp.bfloat16)
        vmem_lim = int(min(max(small_need + (4 << 20), 32 << 20), int(cap * 0.85)))
        out_f = pl.pallas_call(
            _fused_small_kernel,
            out_shape=jax.ShapeDtypeStruct((n_s, dp), jnp.float32),
            grid_spec=pltpu.PrefetchScalarGridSpec(
                num_scalar_prefetch=0,
                grid=(1,),
                in_specs=[pl.BlockSpec((n_s, n_s), lambda i: (0, 0)),
                          pl.BlockSpec((n_s, dp), lambda i: (0, 0)),
                          pl.BlockSpec((n_s, dp), lambda i: (0, 0))],
                out_specs=pl.BlockSpec((n_s, dp), lambda i: (0, 0)),
            ),
            compiler_params=pltpu.CompilerParams(
                dimension_semantics=("arbitrary",),
                vmem_limit_bytes=vmem_lim),
            cost_estimate=pl.CostEstimate(
                flops=2 * 2 * n_s * n_s * dp,
                transcendentals=0,
                bytes_accessed=n_s * n_s * 2 + n_s * dp * (2 + 4 + 4)),
        )(a_p, xb_p, xf_p)
        return out_f[:n, :d].astype(out_dtype)

    # ---------------- large-N scalable tiled path ----------------------------------------
    if tile is not None:
        tm = tk = int(tile)
    else:
        tm = tk = 512 if dp < 2048 else 256       # dp-aware (v7x 64 MiB safety)

    n_pad = _round_up(n, tm)
    # Keep >= 2 row tiles so "parallel" actually shards across v7x's two TensorCores.
    while n_pad // tm < 2 and tm > _LANE:
        tm //= 2
        tk = tm
        n_pad = _round_up(n, tm)

    def _need(tm_, tk_, n_pad_, b_res_):
        b_bytes = 2 * n_pad_ * dp * 2 if b_res_ else 2 * tk_ * dp * 2
        return (2 * tm_ * tk_ * 2        # A tiles, bf16, double-buffered
                + b_bytes                # contraction operand (x / h1), bf16
                + 2 * tm_ * dp * 4       # x f32 row tiles (hop 2)
                + 2 * tm_ * dp * 2       # h1 row tiles / bf16 h1 output tiles
                + 2 * tm_ * dp * 4       # f32 output tiles (hop 2)
                + tm_ * dp * 4           # hop-1 f32 accumulator scratch
                + (2 << 20))

    b_resident = (2 * n_pad * dp * 2) <= cap // 4
    need = _need(tm, tk, n_pad, b_resident)
    while need > int(cap * 0.8) and tm > _LANE:
        tm //= 2
        tk = tm
        n_pad = _round_up(n, tm)
        b_resident = (2 * n_pad * dp * 2) <= cap // 4
        need = _need(tm, tk, n_pad, b_resident)

    vmem_lim = int(min(max(need + (4 << 20), 32 << 20), int(cap * 0.85)))

    a_p = _pad2(a_b, n_pad, n_pad)
    xf_p = _pad2(x_f, n_pad, dp)
    xb_p = xf_p.astype(jnp.bfloat16)

    grid = (n_pad // tm, n_pad // tk)
    a_spec = pl.BlockSpec((tm, tk), lambda i, k: (i, k))
    if b_resident:
        b_spec = pl.BlockSpec((n_pad, dp), lambda i, k: (0, 0))   # constant index -> single DMA
    else:
        b_spec = pl.BlockSpec((tk, dp), lambda i, k: (k, 0))      # fallback: stream per-k
    row_spec = pl.BlockSpec((tm, dp), lambda i, k: (i, 0))

    cparams = pltpu.CompilerParams(
        dimension_semantics=("parallel", "arbitrary"),
        vmem_limit_bytes=vmem_lim)
    hop_flops = 2 * n_pad * n_pad * dp

    # hop 1: h1 = A_hat @ x, emitted in bf16 directly from the finalize
    h1_b = pl.pallas_call(
        functools.partial(_hop1_kernel, tk=tk, b_resident=b_resident),
        out_shape=jax.ShapeDtypeStruct((n_pad, dp), jnp.bfloat16),
        grid_spec=pltpu.PrefetchScalarGridSpec(
            num_scalar_prefetch=0,
            grid=grid,
            in_specs=[a_spec, b_spec],
            out_specs=row_spec,
            scratch_shapes=[pltpu.VMEM((tm, dp), jnp.float32)],
        ),
        compiler_params=cparams,
        cost_estimate=pl.CostEstimate(
            flops=hop_flops, transcendentals=0,
            bytes_accessed=n_pad * n_pad * 2 + 2 * n_pad * dp * 2),
    )(a_p, xb_p)

    # hop 2 fused with the 3-way mean: out = (x + h1 + A_hat @ h1) / 3
    out_f = pl.pallas_call(
        functools.partial(_hop2_kernel, tk=tk, b_resident=b_resident),
        out_shape=jax.ShapeDtypeStruct((n_pad, dp), jnp.float32),
        grid_spec=pltpu.PrefetchScalarGridSpec(
            num_scalar_prefetch=0,
            grid=grid,
            in_specs=[a_spec, b_spec, row_spec, row_spec],
            out_specs=row_spec,
        ),
        compiler_params=cparams,
        cost_estimate=pl.CostEstimate(
            flops=hop_flops, transcendentals=0,
            bytes_accessed=n_pad * n_pad * 2 + n_pad * dp * (2 + 4 + 2 + 4)),
    )(a_p, h1_b, xf_p, h1_b)

    return out_f[:n, :d].astype(out_dtype)


# ---------------------------------------------------------------------------
# Plain-JAX glue: synthetic graph + add_self_loop + graph_dropout + 'both' norm
# ---------------------------------------------------------------------------
def build_normalized_adj(key, n, e, dropout_prob=0.7):
    """Returns A_hat in bf16 (cast fused into the normalization, per perf review)."""
    ks, kd, kw, kdrop = jax.random.split(key, 4)
    src = jax.random.randint(ks, (e,), 0, n)
    dst = jax.random.randint(kd, (e,), 0, n)
    w = jax.random.uniform(kw, (e,), jnp.float32, minval=0.5, maxval=1.5)

    # dgl.add_self_loop: append (i, i) edges with weight 1.0 (DGL default fill).
    src = jnp.concatenate([src, jnp.arange(n)])
    dst = jnp.concatenate([dst, jnp.arange(n)])
    w = jnp.concatenate([w, jnp.ones((n,), jnp.float32)])
    num_edges = e + n

    # graph_dropout(g, keep_prob = 1 - dropout_prob): zero int((1-keep)*E) random edges,
    # indices sampled with replacement, self-loops eligible, no rescale (matches original).
    keep_prob = 1.0 - dropout_prob
    drop_size = int((1.0 - keep_prob) * num_edges)
    rand_idx = jax.random.randint(kdrop, (drop_size,), 0, num_edges)
    w = w.at[rand_idx].set(0.0)

    # norm='both': structural degrees (self-loops count), clamp(min=1), ^(-1/2).
    out_deg = jnp.zeros((n,), jnp.float32).at[src].add(1.0)
    in_deg = jnp.zeros((n,), jnp.float32).at[dst].add(1.0)
    out_norm = jax.lax.rsqrt(jnp.clip(out_deg, 1.0, None))
    in_norm = jax.lax.rsqrt(jnp.clip(in_deg, 1.0, None))

    a = jnp.zeros((n, n), jnp.float32).at[dst, src].add(w)
    return (in_norm[:, None] * a * out_norm[None, :]).astype(jnp.bfloat16)


def gcn_reference(a_hat, x):
    """Pure-JAX reference mirroring the kernel's bf16-operand / f32-accumulate numerics."""
    a32 = a_hat.astype(jnp.float32)
    xb = x.astype(jnp.bfloat16).astype(jnp.float32)
    hp = jax.lax.Precision.HIGHEST
    h1 = jnp.dot(a32, xb, precision=hp)
    h1_b = h1.astype(jnp.bfloat16).astype(jnp.float32)
    h2 = jnp.dot(a32, h1_b, precision=hp)
    return (x.astype(jnp.float32) + h1_b + h2) / 3.0


if __name__ == "__main__":
    key = jax.random.PRNGKey(0)
    k_g1, k_x1, k_g2, k_x2 = jax.random.split(key, 4)

    # Small synthetic graph (64 nodes, 32-dim features) -> fully fused small-N path.
    N1, D1, E1 = 64, 32, 256
    a1 = build_normalized_adj(k_g1, N1, E1, dropout_prob=0.7)
    x1 = jax.random.normal(k_x1, (N1, D1), dtype=jnp.float32)
    out1 = jax.block_until_ready(gcn_forward(a1, x1))
    ref1 = gcn_reference(a1, x1)
    assert out1.shape == (N1, D1)
    assert jnp.allclose(out1, ref1, atol=5e-3, rtol=5e-3), \
        float(jnp.max(jnp.abs(out1 - ref1)))

    # Non-multiple N exercises zero-padding + the scalable tiled (large-N) path.
    N2, D2, E2 = 300, 96, 1200
    a2 = build_normalized_adj(k_g2, N2, E2, dropout_prob=0.7)
    x2 = jax.random.normal(k_x2, (N2, D2), dtype=jnp.float32)
    out2 = jax.block_until_ready(gcn_forward(a2, x2, force_tiled=True, tile=128))
    ref2 = gcn_reference(a2, x2)
    assert out2.shape == (N2, D2)
    assert jnp.allclose(out2, ref2, atol=5e-3, rtol=5e-3), \
        float(jnp.max(jnp.abs(out2 - ref2)))

    print("KERNEL_OK")
</pallas_src>

<mosaic_0001>
module attributes {stable_mosaic.version = 11 : i64} {
  func.func @_fused_small_kernel(%arg0: i32, %arg1: memref<128x128xbf16, #tpu.memory_space<vmem>>, %arg2: memref<128x128xbf16, #tpu.memory_space<vmem>>, %arg3: memref<128x128xf32, #tpu.memory_space<vmem>>, %arg4: memref<128x128xf32, #tpu.memory_space<vmem>>) attributes {dimension_semantics = [#tpu.dimension_semantics<arbitrary>], iteration_bounds = array<i64: 1>, scalar_prefetch = 0 : i64, scratch_operands = 0 : i64, tpu.core_type = #tpu.core_type<tc>, window_params = [{pipeline_mode = #tpu.pipeline_mode<synchronous>, transform_indices = @transform_0, window_bounds = array<i64: 128, 128>}, {pipeline_mode = #tpu.pipeline_mode<synchronous>, transform_indices = @transform_1, window_bounds = array<i64: 128, 128>}, {pipeline_mode = #tpu.pipeline_mode<synchronous>, transform_indices = @transform_2, window_bounds = array<i64: 128, 128>}, {pipeline_mode = #tpu.pipeline_mode<synchronous>, transform_indices = @transform_3, window_bounds = array<i64: 128, 128>}]} {
    %c0 = arith.constant 0 : index
    %c0_0 = arith.constant 0 : index
    %0 = vector.load %arg1[%c0, %c0_0] : memref<128x128xbf16, #tpu.memory_space<vmem>>, vector<128x128xbf16>
    %c0_1 = arith.constant 0 : index
    %c0_2 = arith.constant 0 : index
    %1 = vector.load %arg2[%c0_1, %c0_2] : memref<128x128xbf16, #tpu.memory_space<vmem>>, vector<128x128xbf16>
    %cst = arith.constant dense<0.000000e+00> : vector<128x128xf32>
    %2 = tpu.matmul %0, %1, %cst {dimension_numbers = #tpu.dot_dimension_numbers<[1], [0], [0], [1], [0, 0, 1, 1], [], []>} : vector<128x128xbf16>, vector<128x128xbf16>, vector<128x128xf32> -> vector<128x128xf32>
    %3 = arith.truncf %2 : vector<128x128xf32> to vector<128x128xbf16>
    %cst_3 = arith.constant dense<0.000000e+00> : vector<128x128xf32>
    %4 = tpu.matmul %0, %3, %cst_3 {dimension_numbers = #tpu.dot_dimension_numbers<[1], [0], [0], [1], [0, 0, 1, 1], [], []>} : vector<128x128xbf16>, vector<128x128xbf16>, vector<128x128xf32> -> vector<128x128xf32>
    %c0_4 = arith.constant 0 : index
    %c0_5 = arith.constant 0 : index
    %5 = vector.load %arg3[%c0_4, %c0_5] : memref<128x128xf32, #tpu.memory_space<vmem>>, vector<128x128xf32>
    %6 = arith.extf %3 : vector<128x128xbf16> to vector<128x128xf32>
    %7 = arith.addf %5, %6 : vector<128x128xf32>
    %8 = arith.addf %7, %4 : vector<128x128xf32>
    %cst_6 = arith.constant 0.333333343 : f32
    %9 = vector.broadcast %cst_6 : f32 to vector<128x128xf32>
    %10 = arith.mulf %8, %9 : vector<128x128xf32>
    %c0_7 = arith.constant 0 : index
    %c0_8 = arith.constant 0 : index
    %11 = vector.load %arg4[%c0_7, %c0_8] : memref<128x128xf32, #tpu.memory_space<vmem>>, vector<128x128xf32>
    tpu.vector_store %arg4[%c0_7, %c0_8], %10 {strides = array<i32>} : memref<128x128xf32, #tpu.memory_space<vmem>>, vector<128x128xf32>,
    return
  }
  func.func @transform_0(%arg0: i32) -> (i32, i32) {
    %c0_i32 = arith.constant 0 : i32
    %c0_i32_0 = arith.constant 0 : i32
    %c0_i32_1 = arith.constant 0 : i32
    return %c0_i32, %c0_i32_0 : i32, i32
  }
  func.func @transform_1(%arg0: i32) -> (i32, i32) {
    %c0_i32 = arith.constant 0 : i32
    %c0_i32_0 = arith.constant 0 : i32
    %c0_i32_1 = arith.constant 0 : i32
    return %c0_i32, %c0_i32_0 : i32, i32
  }
  func.func @transform_2(%arg0: i32) -> (i32, i32) {
    %c0_i32 = arith.constant 0 : i32
    %c0_i32_0 = arith.constant 0 : i32
    %c0_i32_1 = arith.constant 0 : i32
    return %c0_i32, %c0_i32_0 : i32, i32
  }
  func.func @transform_3(%arg0: i32) -> (i32, i32) {
    %c0_i32 = arith.constant 0 : i32
    %c0_i32_0 = arith.constant 0 : i32
    %c0_i32_1 = arith.constant 0 : i32
    return %c0_i32, %c0_i32_0 : i32, i32
  }
}

</mosaic_0001>

<bundles_post_ra>
// kernel: tpu_custom_call.1
= control target key start
LH: loop header
LB: loop body
LE: loop exit
PB: predicated region body
PF: predicated region fallthrough
CT: control target
= control target key end

     0   :  { %8 = vsyncpa [#allocation3], 0  ;;  %s800_s0 = inlined_call_operand.hbm [shape: bf16[128,128], index: 0, kind: input, shape index: {}]   ;;  %s801_s1 = inlined_call_operand.hbm [shape: bf16[128,128], index: 1, kind: input, shape index: {}]   ;;  %s802_s2 = inlined_call_operand.hbm [shape: f32[128,128], index: 2, kind: input, shape index: {}]   ;;  %s803_s3 = inlined_call_operand.hbm [shape: f32[128,128], index: 3, kind: output, shape index: {}]  }
   0x1   :  { %9 = vsyncpa [#allocation6], 0 }
   0x2   :  { %10 = vsyncpa [#allocation4], 0  ;;  %s28_s14 = sshll.u32 %s801_s1, 4  ;;  %s674_s15 = smov [#allocation5]   ;;  %s29_s14 = int_to_ptr.hbm [resolvable:$true] %s28_s14 }
   0x3   :  { %s30_s16 = sshll.u32 %s674_s15, 4  ;;  %s15_s19 = sshll.u32 %s800_s0, 4  ;;  %s31_s16 = int_to_ptr.vmem [resolvable:$true] %s30_s16  ;;  %s16_s19 = int_to_ptr.hbm [resolvable:$true] %s15_s19 }
   0x4   :  { %s675_s20 = smov 64   ;;  %s676_s21 = smov 4  }
   0x5   :  { %36 = dma.hbm_to_vmem [thread:$0]  %s29_s14, 1024, %s31_s16, [#allocation6], %s675_s20, %s675_s20, %s676_s21  }
   0x6   :  { %s677_s22 = smov [#allocation2]   ;;  %s41_s26 = sshll.u32 %s802_s2, 4  ;;  %s42_s26 = int_to_ptr.hbm [resolvable:$true] %s41_s26 }
   0x7   :  { %s17_s23 = sshll.u32 %s677_s22, 4  ;;  %s678_s1 = smov [#allocation7]   ;;  %s18_s23 = int_to_ptr.vmem [resolvable:$true] %s17_s23 }
   0x8   :  { %23 = dma.hbm_to_vmem [thread:$0]  %s16_s19, 1024, %s18_s23, [#allocation3], %s675_s20, %s675_s20, %s676_s21  }
   0x9   :  { %s43_s27 = sshll.u32 %s678_s1, 4  ;;  %s679_s28 = smov 128   ;;  %s44_s27 = int_to_ptr.vmem [resolvable:$true] %s43_s27 }
   0xa   :  { %s680_s29 = smov 8  }
   0xb   :  { %49 = dma.hbm_to_vmem [thread:$0]  %s42_s26, 2048, %s44_s27, [#allocation6], %s679_s28, %s679_s28, %s680_s29  }
   0xc   :  { %668 = dma.done.wait [#allocation3], 1024  }
   0xd   :  { %669 = vsyncadd [#allocation3], 4294966272 }
   0xe   :  { %670 = dma.done.wait [#allocation6], 3072  }
   0xf   :  { %671 = vsyncadd [#allocation6], 4294964224  ;;  %v547_v0 = vld [vmem:[#allocation5 + $0x38] sm:$0xff]  ;;  %v546_v1 = vld [vmem:[#allocation5 + $0x30] sm:$0xff]  ;;  %s681_s0 = smov [#allocation8]   ;;  %s454_s5 = sshll.u32 %s803_s3, 4  ;;  %s455_s5 = int_to_ptr.hbm [resolvable:$true] %s454_s5 }
  0x10   :  { %548 = vmatpush.bf16.msra.mxu2 %v547_v0  ;;  %190 = vmatpush.bf16.msra.mxu0 %v547_v0  ;;  %v545_v2 = vld [vmem:[#allocation5 + $0x28] sm:$0xff]  ;;  %v544_v3 = vld [vmem:[#allocation5 + $0x20] sm:$0xff]  ;;  %v543_v4 = vld [vmem:[#allocation5 + $0x18] sm:$0xff]  ;;  %s452_s2 = sshll.u32 %s681_s0, 4  ;;  %s453_s2 = int_to_ptr.vmem [resolvable:$true] %s452_s2 }
  0x11   :  { %v542_v5 = vld [vmem:[#allocation5 + $0x10] sm:$0xff]  ;;  %v541_v6 = vld [vmem:[#allocation5 + $0x8] sm:$0xff]  ;;  %v540_v7 = vld [vmem:[#allocation5] sm:$0xff] }
  0x12   :  { %v714_v8 = vld [vmem:[#allocation2 + $0x20] sm:$0xff]  ;;  %v720_v10 = vld [vmem:[#allocation2 + $0x28] sm:$0xff]  ;;  %v726_v12 = vld [vmem:[#allocation2 + $0x30] sm:$0xff] }
  0x13   :  { %v716_v9 = vld [vmem:[#allocation2] sm:$0xff]  ;;  %v722_v11 = vld [vmem:[#allocation2 + $0x8] sm:$0xff]  ;;  %v728_v13 = vld [vmem:[#allocation2 + $0x10] sm:$0xff] }
  0x14   :  { %549 = vmatpush.bf16.msra.mxu2 %v546_v1  ;;  %191 = vmatpush.bf16.msra.mxu0 %v546_v1  ;;  %v732_v14 = vld [vmem:[#allocation2 + $0x38] sm:$0xff] }
  0x15   :  { %v734_v15 = vld [vmem:[#allocation2 + $0x18] sm:$0xff] }
  0x18   :  { %550 = vmatpush.bf16.msra.mxu2 %v545_v2  ;;  %192 = vmatpush.bf16.msra.mxu0 %v545_v2 }
  0x1c   :  { %551 = vmatpush.bf16.msra.mxu2 %v544_v3  ;;  %193 = vmatpush.bf16.msra.mxu0 %v544_v3 }
  0x20   :  { %552 = vmatpush.bf16.msra.mxu2 %v543_v4  ;;  %194 = vmatpush.bf16.msra.mxu0 %v543_v4 }
  0x24   :  { %553 = vmatpush.bf16.msra.mxu2 %v542_v5  ;;  %195 = vmatpush.bf16.msra.mxu0 %v542_v5 }
  0x28   :  { %554 = vmatpush.bf16.msra.mxu2 %v541_v6  ;;  %196 = vmatpush.bf16.msra.mxu0 %v541_v6 }
  0x2c   :  { %555 = vmatpush.bf16.msra.mxu2 %v540_v7  ;;  %197 = vmatpush.bf16.msra.mxu0 %v540_v7 }
  0x2f   :  { %218 = vmatmul.bf16.vlgmr.msra.gmra.mxu2 %v714_v8  ;;  %198 = vmatmul.bf16.vlgmr.msra.gmra.mxu0 %v716_v9 }
  0x3f   :  { %223 = vmatmul.bf16.gmra.mxu2 %v720_v10  ;;  %203 = vmatmul.bf16.gmra.mxu0 %v722_v11 }
  0x4f   :  { %228 = vmatmul.bf16.gmra.mxu2 %v726_v12  ;;  %208 = vmatmul.bf16.gmra.mxu0 %v728_v13 }
  0x5f   :  { %233 = vmatmul.bf16.gmra.mxu2 %v732_v14  ;;  %213 = vmatmul.bf16.gmra.mxu0 %v734_v15 }
  0xac   :  { %v199_v16 = vpop.f32.mrf.mxu0 }
  0xad   :  { %v239_v63 = vpack.c.bf16 %v199_v16, %v199_v16 }
  0xaf   :  { %v271_v4 = vunpack.c.l.b16 %v239_v63  ;;  %v368_v16 = vunpack.c.l.bf16 %v239_v63  ;;  %v356_v63 = vld [vmem:[#allocation7 + $0x20] sm:$0xff] }
  0xb2   :  { %v219_v17 = vpop.f32.mrf.mxu2 }
  0xb3   :  { %v247_v45 = vpack.c.bf16 %v219_v17, %v219_v17  ;;  %v352_v17 = vld [vmem:[#allocation7] sm:$0xff] }
  0xb4   :  { %v201_v18 = vpop.f32.mrf.mxu0 }
  0xb5   :  { %v279_v52 = vunpack.c.l.b16 %v247_v45  ;;  %v240_v0 = vpack.c.bf16 %v201_v18, %v201_v18  ;;  %v384_v18 = vadd.f32 %v368_v16, %v352_v17  ;;  %v357_v17 = vld [vmem:[#allocation7 + $0x28] sm:$0xff] }
  0xb7   :  { %v272_v5 = vunpack.c.l.b16 %v240_v0 }
  0xb9   :  { %v287_v7 = vpack.c.b16 %v272_v5, %v271_v4 }
  0xba   :  { %v221_v19 = vpop.f32.mrf.mxu2 }
  0xbb   :  { %v754_v42 = vpack.c.bf16 %v221_v19, %v221_v19 }
  0xbc   :  { %v204_v21 = vpop.f32.mrf.mxu0 }
  0xbd   :  { %v280_v48 = vunpack.c.l.b16 %v754_v42  ;;  %v241_v58 = vpack.c.bf16 %v204_v21, %v204_v21  ;;  %v360_v21 = vld [vmem:[#allocation7 + $0x40] sm:$0xff] }
  0xbf   :  { %v291_v53 = vpack.c.b16 %v280_v48, %v279_v52  ;;  %v273_v1 = vunpack.c.l.b16 %v241_v58 }
  0xc2   :  { %v224_v20 = vpop.f32.mrf.mxu2 }
  0xc3   :  { %v751_v40 = vpack.c.bf16 %v224_v20, %v224_v20  ;;  %v376_v20 = vunpack.c.l.bf16 %v247_v45  ;;  %v362_v45 = vld [vmem:[#allocation7 + $0x50] sm:$0xff] }
  0xc4   :  { %v206_v23 = vpop.f32.mrf.mxu0 }
  0xc5   :  { %v281_v47 = vunpack.c.l.b16 %v751_v40  ;;  %v769_v59 = vpack.c.bf16 %v206_v23, %v206_v23 }
  0xc7   :  { %v274_v2 = vunpack.c.l.b16 %v769_v59 }
  0xc9   :  { %v288_v6 = vpack.c.b16 %v274_v2, %v273_v1 }
  0xca   :  { %v226_v22 = vpop.f32.mrf.mxu2 }
  0xcb   :  { %v748_v37 = vpack.c.bf16 %v226_v22, %v226_v22 }
  0xcc   :  { %v209_v25 = vpop.f32.mrf.mxu0 }
  0xcd   :  { %v282_v43 = vunpack.c.l.b16 %v748_v37  ;;  %v763_v54 = vpack.c.bf16 %v209_v25, %v209_v25 }
  0xcf   :  { %v292_v51 = vpack.c.b16 %v282_v43, %v281_v47  ;;  %v275_v60 = vunpack.c.l.b16 %v763_v54  ;;  %v355_v47 = vld [vmem:[#allocation7 + $0x18] sm:$0xff] }
  0xd2   :  { %v229_v24 = vpop.f32.mrf.mxu2 }
  0xd3   :  { %v744_v34 = vpack.c.bf16 %v229_v24, %v229_v24 }
  0xd4   :  { %v211_v27 = vpop.f32.mrf.mxu0 }
  0xd5   :  { %v283_v41 = vunpack.c.l.b16 %v744_v34  ;;  %v765_v55 = vpack.c.bf16 %v211_v27, %v211_v27  ;;  %v370_v27 = vunpack.c.l.bf16 %v241_v58  ;;  %v380_v4 = vunpack.c.l.bf16 %v744_v34 }
  0xd7   :  { %v276_v61 = vunpack.c.l.b16 %v765_v55 }
  0xd9   :  { %v289_v3 = vpack.c.b16 %v276_v61, %v275_v60  ;;  %v363_v61 = vld [vmem:[#allocation7 + $0x58] sm:$0xff] }
  0xda   :  { %v231_v26 = vpop.f32.mrf.mxu2 }
  0xdb   :  { %v740_v32 = vpack.c.bf16 %v231_v26, %v231_v26  ;;  %v361_v26 = vld [vmem:[#allocation7 + $0x48] sm:$0xff] }
  0xdc   :  { %v214_v30 = vpop.f32.mrf.mxu0 }
  0xdd   :  { %v284_v38 = vunpack.c.l.b16 %v740_v32  ;;  %v759_v49 = vpack.c.bf16 %v214_v30, %v214_v30  ;;  %v354_v30 = vld [vmem:[#allocation7 + $0x10] sm:$0xff] }
  0xdf   :  { %v293_v44 = vpack.c.b16 %v284_v38, %v283_v41  ;;  %v277_v56 = vunpack.c.l.b16 %v759_v49  ;;  %v386_v38 = vadd.f32 %v370_v27, %v354_v30  ;;  %v378_v41 = vunpack.c.l.bf16 %v751_v40  ;;  %v366_v27 = vld [vmem:[#allocation7 + $0x70] sm:$0xff]  ;;  %v359_v30 = vld [vmem:[#allocation7 + $0x38] sm:$0xff] }
  0xe0   :  { %v372_v40 = vunpack.c.l.bf16 %v763_v54  ;;  %v374_v34 = vunpack.c.l.bf16 %v759_v49 }
  0xe1   :  { %v394_v48 = vadd.f32 %v378_v41, %v362_v45 }
  0xe2   :  { %v234_v28 = vpop.f32.mrf.mxu2  ;;  %v388_v2 = vadd.f32 %v372_v40, %v356_v63 }
  0xe3   :  { %v738_v29 = vpack.c.bf16 %v234_v28, %v234_v28 }
  0xe4   :  { %v216_v46 = vpop.f32.mrf.mxu0 }
  0xe5   :  { %v285_v35 = vunpack.c.l.b16 %v738_v29  ;;  %v761_v50 = vpack.c.bf16 %v216_v46, %v216_v46 }
  0xe7   :  { %v278_v57 = vunpack.c.l.b16 %v761_v50 }
  0xe9   :  { %v290_v62 = vpack.c.b16 %v278_v57, %v277_v56  ;;  %v379_v57 = vunpack.c.l.bf16 %v748_v37  ;;  %v373_v37 = vunpack.c.l.bf16 %v765_v55 }
  0xea   :  { %v236_v31 = vpop.f32.mrf.mxu2 }
  0xeb   :  { %v742_v33 = vpack.c.bf16 %v236_v31, %v236_v31 }
  0xed   :  { %v286_v36 = vunpack.c.l.b16 %v742_v33 }
  0xef   :  { %v294_v39 = vpack.c.b16 %v286_v36, %v285_v35 }
  0xf1   :  { %303 = vmatpush.bf16.msra.mxu1 %v294_v39  ;;  %556 = vmatpush.bf16.msra.mxu3 %v294_v39 }
  0xf5   :  { %304 = vmatpush.bf16.msra.mxu1 %v293_v44  ;;  %557 = vmatpush.bf16.msra.mxu3 %v293_v44 }
  0xf9   :  { %305 = vmatpush.bf16.msra.mxu1 %v292_v51  ;;  %558 = vmatpush.bf16.msra.mxu3 %v292_v51 }
  0xfd   :  { %306 = vmatpush.bf16.msra.mxu1 %v291_v53  ;;  %559 = vmatpush.bf16.msra.mxu3 %v291_v53 }
 0x101   :  { %307 = vmatpush.bf16.msra.mxu1 %v290_v62  ;;  %560 = vmatpush.bf16.msra.mxu3 %v290_v62 }
 0x105   :  { %308 = vmatpush.bf16.msra.mxu1 %v289_v3  ;;  %561 = vmatpush.bf16.msra.mxu3 %v289_v3 }
 0x109   :  { %309 = vmatpush.bf16.msra.mxu1 %v288_v6  ;;  %562 = vmatpush.bf16.msra.mxu3 %v288_v6 }
 0x10d   :  { %310 = vmatpush.bf16.msra.mxu1 %v287_v7  ;;  %563 = vmatpush.bf16.msra.mxu3 %v287_v7  ;;  %v364_v7 = vld [vmem:[#allocation7 + $0x60] sm:$0xff] }
 0x10e   :  { %v396_v54 = vadd.f32 %v380_v4, %v364_v7 }
 0x110   :  { %311 = vmatmul.bf16.vlgmr.msra.gmra.mxu1 %v716_v9  ;;  %331 = vmatmul.bf16.vlgmr.msra.gmra.mxu3 %v714_v8  ;;  %v369_v8 = vunpack.c.l.bf16 %v240_v0 }
 0x120   :  { %316 = vmatmul.bf16.gmra.mxu1 %v722_v11  ;;  %336 = vmatmul.bf16.gmra.mxu3 %v720_v10  ;;  %v353_v11 = vld [vmem:[#allocation7 + $0x8] sm:$0xff]  ;;  %v392_v10 = vadd.f32 %v376_v20, %v360_v21  ;;  %v389_v20 = vadd.f32 %v373_v37, %v357_v17  ;;  %v381_v21 = vunpack.c.l.bf16 %v740_v32  ;;  %v375_v32 = vunpack.c.l.bf16 %v761_v50 }
 0x121   :  { %v385_v24 = vadd.f32 %v369_v8, %v353_v11  ;;  %v365_v11 = vld [vmem:[#allocation7 + $0x68] sm:$0xff] }
 0x122   :  { %v397_v55 = vadd.f32 %v381_v21, %v365_v11 }
 0x130   :  { %321 = vmatmul.bf16.gmra.mxu1 %v728_v13  ;;  %341 = vmatmul.bf16.gmra.mxu3 %v726_v12 }
 0x140   :  { %326 = vmatmul.bf16.gmra.mxu1 %v734_v15  ;;  %346 = vmatmul.bf16.gmra.mxu3 %v732_v14  ;;  %v377_v15 = vunpack.c.l.bf16 %v754_v42  ;;  %v371_v42 = vunpack.c.l.bf16 %v769_v59  ;;  %v395_v59 = vadd.f32 %v379_v57, %v363_v61 }
 0x142   :  { %v393_v31 = vadd.f32 %v377_v15, %v361_v26  ;;  %v387_v53 = vadd.f32 %v371_v42, %v355_v47 }
 0x18d   :  { %v312_v19 = vpop.f32.mrf.mxu1 }
 0x18e   :  { %v400_v9 = vadd.f32 %v384_v18, %v312_v19 }
 0x190   :  { %v416_v22 = vmul.f32 0.33333334, %v400_v9 }
 0x192   :  { %432 = vst [vmem:[#allocation8] sm:$0xff] %v416_v22 }
 0x193   :  { %v332_v23 = vpop.f32.mrf.mxu3 }
 0x194   :  { %v408_v13 = vadd.f32 %v392_v10, %v332_v23  ;;  %v358_v23 = vld [vmem:[#allocation7 + $0x30] sm:$0xff] }
 0x195   :  { %v314_v12 = vpop.f32.mrf.mxu1 }
 0x196   :  { %v424_v25 = vmul.f32 0.33333334, %v408_v13  ;;  %v401_v14 = vadd.f32 %v385_v24, %v314_v12  ;;  %v390_v12 = vadd.f32 %v374_v34, %v358_v23 }
 0x198   :  { %440 = vst [vmem:[#allocation8 + $0x40] sm:$0xff] %v424_v25  ;;  %v417_v28 = vmul.f32 0.33333334, %v401_v14  ;;  %v382_v25 = vunpack.c.l.bf16 %v738_v29 }
 0x19a   :  { %433 = vst [vmem:[#allocation8 + $0x8] sm:$0xff] %v417_v28  ;;  %v398_v49 = vadd.f32 %v382_v25, %v366_v27 }
 0x19b   :  { %v334_v35 = vpop.f32.mrf.mxu3 }
 0x19c   :  { %v409_v36 = vadd.f32 %v393_v31, %v334_v35 }
 0x19d   :  { %v317_v39 = vpop.f32.mrf.mxu1 }
 0x19e   :  { %v425_v43 = vmul.f32 0.33333334, %v409_v36  ;;  %v402_v44 = vadd.f32 %v386_v38, %v317_v39  ;;  %v391_v36 = vadd.f32 %v375_v32, %v359_v30  ;;  %v383_v39 = vunpack.c.l.bf16 %v742_v33 }
 0x1a0   :  { %441 = vst [vmem:[#allocation8 + $0x48] sm:$0xff] %v425_v43  ;;  %v418_v46 = vmul.f32 0.33333334, %v402_v44  ;;  %v367_v44 = vld [vmem:[#allocation7 + $0x78] sm:$0xff] }
 0x1a1   :  { %v399_v45 = vadd.f32 %v383_v39, %v367_v44 }
 0x1a2   :  { %434 = vst [vmem:[#allocation8 + $0x10] sm:$0xff] %v418_v46 }
 0x1a3   :  { %v337_v51 = vpop.f32.mrf.mxu3 }
 0x1a4   :  { %v410_v52 = vadd.f32 %v394_v48, %v337_v51 }
 0x1a5   :  { %v319_v56 = vpop.f32.mrf.mxu1 }
 0x1a6   :  { %v426_v58 = vmul.f32 0.33333334, %v410_v52  ;;  %v403_v60 = vadd.f32 %v387_v53, %v319_v56 }
 0x1a8   :  { %442 = vst [vmem:[#allocation8 + $0x50] sm:$0xff] %v426_v58  ;;  %v419_v62 = vmul.f32 0.33333334, %v403_v60 }
 0x1aa   :  { %435 = vst [vmem:[#allocation8 + $0x18] sm:$0xff] %v419_v62 }
 0x1ab   :  { %v339_v0 = vpop.f32.mrf.mxu3 }
 0x1ac   :  { %v411_v1 = vadd.f32 %v395_v59, %v339_v0 }
 0x1ad   :  { %v322_v3 = vpop.f32.mrf.mxu1 }
 0x1ae   :  { %v427_v5 = vmul.f32 0.33333334, %v411_v1  ;;  %v404_v6 = vadd.f32 %v388_v2, %v322_v3 }
 0x1b0   :  { %443 = vst [vmem:[#allocation8 + $0x58] sm:$0xff] %v427_v5  ;;  %v420_v16 = vmul.f32 0.33333334, %v404_v6 }
 0x1b2   :  { %436 = vst [vmem:[#allocation8 + $0x20] sm:$0xff] %v420_v16 }
 0x1b3   :  { %v342_v18 = vpop.f32.mrf.mxu3 }
 0x1b4   :  { %v412_v19 = vadd.f32 %v396_v54, %v342_v18 }
 0x1b5   :  { %v324_v9 = vpop.f32.mrf.mxu1 }
 0x1b6   :  { %v428_v8 = vmul.f32 0.33333334, %v412_v19  ;;  %v405_v22 = vadd.f32 %v389_v20, %v324_v9 }
 0x1b8   :  { %444 = vst [vmem:[#allocation8 + $0x60] sm:$0xff] %v428_v8  ;;  %v421_v10 = vmul.f32 0.33333334, %v405_v22 }
 0x1ba   :  { %437 = vst [vmem:[#allocation8 + $0x28] sm:$0xff] %v421_v10 }
 0x1bb   :  { %v344_v13 = vpop.f32.mrf.mxu3 }
 0x1bc   :  { %v413_v24 = vadd.f32 %v397_v55, %v344_v13 }
 0x1bd   :  { %v327_v15 = vpop.f32.mrf.mxu1 }
 0x1be   :  { %v429_v14 = vmul.f32 0.33333334, %v413_v24  ;;  %v406_v26 = vadd.f32 %v390_v12, %v327_v15 }
 0x1c0   :  { %445 = vst [vmem:[#allocation8 + $0x68] sm:$0xff] %v429_v14  ;;  %v422_v28 = vmul.f32 0.33333334, %v406_v26 }
 0x1c2   :  { %438 = vst [vmem:[#allocation8 + $0x30] sm:$0xff] %v422_v28 }
 0x1c3   :  { %v347_v31 = vpop.f32.mrf.mxu3 }
 0x1c4   :  { %v414_v35 = vadd.f32 %v398_v49, %v347_v31 }
 0x1c5   :  { %v329_v38 = vpop.f32.mrf.mxu1 }
 0x1c6   :  { %v430_v41 = vmul.f32 0.33333334, %v414_v35  ;;  %v407_v43 = vadd.f32 %v391_v36, %v329_v38 }
 0x1c8   :  { %446 = vst [vmem:[#allocation8 + $0x70] sm:$0xff] %v430_v41  ;;  %v423_v29 = vmul.f32 0.33333334, %v407_v43 }
 0x1ca   :  { %439 = vst [vmem:[#allocation8 + $0x38] sm:$0xff] %v423_v29 }
 0x1cb   :  { %v349_v42 = vpop.f32.mrf.mxu3 }
 0x1cc   :  { %v415_v50 = vadd.f32 %v399_v45, %v349_v42 }
 0x1ce   :  { %v431_v46 = vmul.f32 0.33333334, %v415_v50 }
 0x1d0   :  { %447 = vst [vmem:[#allocation8 + $0x78] sm:$0xff] %v431_v46 }
 0x1d1   :  { %460 = dma.vmem_to_hbm [thread:$0]  %s453_s2, 2048, %s455_s5, [#allocation4], %s679_s28, %s679_s28, %s680_s29  }
 0x1d2   :  { %672 = dma.done.wait [#allocation4], 2048  }
 0x1d3   :  { %673 = vsyncadd [#allocation4], 4294965248 }
 0x1d4   :  { %465 = vsyncpa [#allocation3], 1 }
 0x1d5   :  { %466 = vsyncpa [#allocation6], 1 }
 0x1d6   :  { %467 = vsyncpa [#allocation4], 1 }

</bundles_post_ra>
